<compile_context>
chip_gen: v7x
topology: tpu7x:2x2x1
jax: 0.10.0
libtpu: 0.0.40
codegen_flags: <defaults>
</compile_context>

<pallas_src>
import math
import functools

import jax
import jax.numpy as jnp
import numpy as np
from jax.experimental import pallas as pl
from jax.experimental.pallas import tpu as pltpu


# ----------------------------------------------------------------------------
# Generation-aware budgets (v5e/v6e: 128 MiB VMEM; v7x: 64 MiB per TensorCore).
# ----------------------------------------------------------------------------
@functools.lru_cache(maxsize=None)
def _vmem_capacity_bytes():
    try:
        return int(pltpu.get_tpu_info().vmem_capacity_bytes)
    except Exception:
        return 64 << 20          # conservative fallback (v7x per-TC)


def _budgets():
    """Returns (per-step tile budget, vmem_limit cap)."""
    if _vmem_capacity_bytes() >= (100 << 20):   # v5e / v6e: 128 MiB physical VMEM
        return 20 << 20, 96 << 20
    return 8 << 20, 48 << 20                    # v7x: 64 MiB -> smaller tiles + headroom


def _choose_batch_tile(B2, per_sample_bytes, budget):
    """Batch tile: divisor of B2 that is either B2 itself or a multiple of 8
    (keeps the output block's second-minor dim legal), largest fitting the budget."""
    cands = [d for d in range(1, B2 + 1)
             if B2 % d == 0 and (d == B2 or d % 8 == 0)]
    fitting = [d for d in cands if d * per_sample_bytes <= budget]
    return max(fitting) if fitting else min(cands)


# ----------------------------------------------------------------------------
# Ring masks for get_part_pool (pool='avg', no_overlap=True).
#
# Ring i = box_i minus box_{i-1}, but it is divided by area(box_i) (PyTorch's
# pad-then-AdaptiveAvgPool quirk) — this intentionally matches the reference;
# do NOT "fix" it into a true ring mean.
# ----------------------------------------------------------------------------
def _ring_masks(H, W, block):
    c_h, c_w = H // 2, W // 2
    per_h = math.floor(H / (2 * block))
    per_w = math.floor(W / (2 * block))
    # TODO(synk): the bilinear-interpolate branch (per_h<1 and per_w<1) and the odd-H
    # 'ep' padding branch of get_part_pool are not implemented; they never trigger
    # for these feature-map shapes.
    assert per_h >= 1 and per_w >= 1
    assert H % 2 == 0 and W % 2 == 0
    masks = np.zeros((block, H, W), np.float32)
    inv_areas = []
    prev = np.zeros((H, W), bool)
    for i in range(1, block + 1):
        box = np.zeros((H, W), bool)
        if i < block:
            box[c_h - i * per_h:c_h + i * per_h,
                c_w - i * per_w:c_w + i * per_w] = True
        else:
            box[:, :] = True
        masks[i - 1][box & ~prev] = 1.0
        inv_areas.append(1.0 / float(box.sum()))
        prev = box
    return masks.reshape(block, H * W), tuple(inv_areas)


# ----------------------------------------------------------------------------
# Kernel 1: ring average pool.
#   mask_ref: (block, HW) bf16 {0,1}   x_ref: (Bt, HW, C) bf16
#   out_ref : (block, Bt, C) f32
# One bf16 MXU matmul per sample reduces HW; the per-ring 1/area(box_i) scale is
# applied afterwards in f32 (splat constants only — exact, Mosaic-safe).
# ----------------------------------------------------------------------------
def _part_pool_kernel(mask_ref, x_ref, out_ref, *, inv_areas):
    m = mask_ref[...]                              # (block, HW) bf16
    bt = x_ref.shape[0]
    block = len(inv_areas)
    for b in range(bt):                            # static unroll; MXU work hidden under DMA
        s = jnp.dot(m, x_ref[b], preferred_element_type=jnp.float32)   # (block, C)
        for r in range(block):
            out_ref[r, b:b + 1, :] = s[r:r + 1, :] * inv_areas[r]


def part_pool(x_nhwc, block):
    B2, H, W, C = x_nhwc.shape
    masks_np, inv_areas = _ring_masks(H, W, block)
    masks = jnp.asarray(masks_np, dtype=jnp.bfloat16)          # binary -> exact in bf16
    # bf16 features: halves the dominant HBM read; reshape to (B2, H*W, C) is glue.
    x = x_nhwc.astype(jnp.bfloat16).reshape(B2, H * W, C)

    tile_budget, vmem_cap = _budgets()
    per_sample = H * W * C * 2                                 # bf16 bytes / sample
    Bt = _choose_batch_tile(B2, per_sample, tile_budget)
    n_bt = B2 // Bt

    in_tile = Bt * per_sample
    out_tile = block * Bt * C * 4
    mask_bytes = block * H * W * 2
    vmem_limit = int(min(vmem_cap,
                         max(4 << 20,
                             2 * (in_tile + out_tile + mask_bytes) + (4 << 20))))

    kernel = functools.partial(_part_pool_kernel, inv_areas=inv_areas)
    return pl.pallas_call(
        kernel,
        out_shape=jax.ShapeDtypeStruct((block, B2, C), jnp.float32),
        grid=(n_bt,),
        in_specs=[
            pl.BlockSpec((block, H * W), lambda b: (0, 0)),
            pl.BlockSpec((Bt, H * W, C), lambda b: (b, 0, 0)),
        ],
        out_specs=pl.BlockSpec((block, Bt, C), lambda b: (0, b, 0)),
        compiler_params=pltpu.CompilerParams(
            dimension_semantics=("parallel",),
            vmem_limit_bytes=vmem_limit),
    )(masks, x)


# ----------------------------------------------------------------------------
# Kernel 2: part_classifier — per-ring ClassBlock
#   Linear(C -> num_bottleneck) -> Dropout (identity in eval) -> Linear(-> class_num)
# Grid = (block,): one ring per step, full-K bf16 MXU matmuls, f32 accumulation.
# Weight DMA for ring i+1 overlaps ring i's MXU work via the normal pipeline.
# ----------------------------------------------------------------------------
def _classblock_kernel(x_ref, w1_ref, b1_ref, w2_ref, b2_ref, o_ref):
    x = x_ref[0].astype(jnp.bfloat16)                               # (B2, C)
    h = jnp.dot(x, w1_ref[0], preferred_element_type=jnp.float32) + b1_ref[0]
    # Dropout(p=droprate) is identity in eval mode.
    y = jnp.dot(h.astype(jnp.bfloat16), w2_ref[0],
                preferred_element_type=jnp.float32)
    o_ref[0] = y + b2_ref[0]


def part_classifier(pooled, w1, b1, w2, b2):
    # pooled: (block, B2, C) f32;  w1: (block, C, NB) bf16;  w2: (block, NB, CLS) bf16
    block, B2, C = pooled.shape
    NB = w1.shape[2]
    CLS = w2.shape[2]

    # Lane-dense output: pad the class dim to a multiple of 128 (unmasked stores).
    CLSp = max(128, ((CLS + 127) // 128) * 128)
    if CLSp != CLS:
        w2 = jnp.pad(w2, ((0, 0), (0, 0), (0, CLSp - CLS)))
        b2 = jnp.pad(b2, ((0, 0), (0, 0), (0, CLSp - CLS)))

    _, vmem_cap = _budgets()
    step = (B2 * C * 4 + C * NB * w1.dtype.itemsize + NB * b1.dtype.itemsize
            + NB * CLSp * w2.dtype.itemsize + CLSp * b2.dtype.itemsize
            + B2 * CLSp * 4)
    vmem_limit = int(min(vmem_cap, max(4 << 20, 2 * step + (4 << 20))))

    y = pl.pallas_call(
        _classblock_kernel,
        out_shape=jax.ShapeDtypeStruct((block, B2, CLSp), jnp.float32),
        grid=(block,),
        in_specs=[
            pl.BlockSpec((1, B2, C), lambda i: (i, 0, 0)),
            pl.BlockSpec((1, C, NB), lambda i: (i, 0, 0)),
            pl.BlockSpec((1, 1, NB), lambda i: (i, 0, 0)),
            pl.BlockSpec((1, NB, CLSp), lambda i: (i, 0, 0)),
            pl.BlockSpec((1, 1, CLSp), lambda i: (i, 0, 0)),
        ],
        out_specs=pl.BlockSpec((1, B2, CLSp), lambda i: (i, 0, 0)),
        compiler_params=pltpu.CompilerParams(
            dimension_semantics=("parallel",),
            vmem_limit_bytes=vmem_limit),
    )(pooled, w1, b1, w2, b2)
    # PyTorch eval-mode convention torch.stack(y, dim=2) -> (B, class_num, block) is
    # produced only here, at the final boundary (pure XLA glue), after un-padding.
    return jnp.transpose(y[..., :CLS], (1, 2, 0))


# ----------------------------------------------------------------------------
# LPN forward_: both branches share the per-part classifiers, so the branches are
# fused along batch — classifier weights are streamed from HBM only once.
# ----------------------------------------------------------------------------
def lpn_forward(x1_nchw, x2_nchw, params, block):
    xs = [x for x in (x1_nchw, x2_nchw) if x is not None]
    if not xs:
        return None, None
    x = xs[0] if len(xs) == 1 else jnp.concatenate(xs, axis=0)
    x_nhwc = jnp.transpose(x, (0, 2, 3, 1))          # NCHW -> NHWC (glue)
    pooled = part_pool(x_nhwc, block)                # (block, Btot, C) f32
    y = part_classifier(pooled, *params)             # (Btot, class_num, block)
    if x1_nchw is None:
        return None, y
    if x2_nchw is None:
        return y, None
    b1 = x1_nchw.shape[0]
    return y[:b1], y[b1:]


# ----------------------------------------------------------------------------
# Pure-JAX reference (literal translation of the PyTorch pad/subtract code).
# Note: ClassBlock in this spec is Linear -> Dropout -> Linear (no BatchNorm).
# ----------------------------------------------------------------------------
def ref_forward(x_nchw, params, block):
    w1, b1, w2, b2 = params
    w1 = w1.astype(jnp.float32)
    w2 = w2.astype(jnp.float32)
    B, C, H, W = x_nchw.shape
    c_h, c_w = H // 2, W // 2
    per = math.floor(H / (2 * block))
    x = x_nchw.astype(jnp.float32)
    rings = []
    for i in range(1, block + 1):
        if i < block:
            cur = x[:, :, c_h - i * per:c_h + i * per, c_w - i * per:c_w + i * per]
            if i > 1:
                pre = x[:, :, c_h - (i - 1) * per:c_h + (i - 1) * per,
                              c_w - (i - 1) * per:c_w + (i - 1) * per]
                cur = cur.at[:, :, per:-per, per:-per].add(-pre)
            rings.append(cur.mean(axis=(2, 3)))
        else:
            pre = x[:, :, c_h - (i - 1) * per:c_h + (i - 1) * per,
                          c_w - (i - 1) * per:c_w + (i - 1) * per]
            pad = c_h - (i - 1) * per
            full = x.at[:, :, pad:H - pad, pad:W - pad].add(-pre)
            rings.append(full.mean(axis=(2, 3)))
    pooled = jnp.stack(rings, axis=0)                    # (block, B, C)
    outs = []
    for i in range(block):
        h = pooled[i] @ w1[i] + b1[i, 0]
        outs.append(h @ w2[i] + b2[i, 0])
    return jnp.stack(outs, axis=2)                       # (B, class_num, block)


if __name__ == "__main__":
    # Small shapes consistent with the module (scaled down from C=2048, NB=512).
    B, C, H, W = 2, 64, 16, 16
    BLOCK, NB, CLS = 4, 32, 16

    key = jax.random.PRNGKey(0)
    kx1, kx2, kw1, kw2 = jax.random.split(key, 4)

    # Post-backbone feature maps (stand-in for seresnet50 layer4 output), NCHW.
    x1 = jax.random.normal(kx1, (B, C, H, W), jnp.float32)
    x2 = jax.random.normal(kx2, (B, C, H, W), jnp.float32)

    # Deterministic parameter init mirroring the PyTorch init schemes:
    #  add_block Linear:  kaiming_normal fan_out (std = sqrt(2/out)), bias 0
    #  classifier Linear: normal std=0.001, bias 0
    # Weights are stored in bf16 (halved weight HBM traffic); biases stay f32.
    w1 = (jax.random.normal(kw1, (BLOCK, C, NB), jnp.float32)
          * math.sqrt(2.0 / NB)).astype(jnp.bfloat16)
    b1 = jnp.zeros((BLOCK, 1, NB), jnp.float32)
    w2 = (jax.random.normal(kw2, (BLOCK, NB, CLS), jnp.float32)
          * 0.001).astype(jnp.bfloat16)
    b2 = jnp.zeros((BLOCK, 1, CLS), jnp.float32)
    params = (w1, b1, w2, b2)

    fwd = jax.jit(functools.partial(lpn_forward, params=params, block=BLOCK))
    y1, y2 = fwd(x1, x2)
    jax.block_until_ready((y1, y2))

    # Correctness check against the literal (pad-and-subtract) f32 reference.
    # The reference is fed the same bf16-cast features (the deliberate precision
    # boundary); remaining mismatch is only the bf16 MXU operand casts.
    r1 = ref_forward(x1.astype(jnp.bfloat16), params, BLOCK)
    r2 = ref_forward(x2.astype(jnp.bfloat16), params, BLOCK)
    np.testing.assert_allclose(np.asarray(y1), np.asarray(r1), rtol=2e-2, atol=2e-4)
    np.testing.assert_allclose(np.asarray(y2), np.asarray(r2), rtol=2e-2, atol=2e-4)
    assert y1.shape == (B, CLS, BLOCK) and y2.shape == (B, CLS, BLOCK)

    print("KERNEL_OK")
</pallas_src>

<mosaic_0001>
module attributes {stable_mosaic.version = 11 : i64} {
  func.func @_part_pool_kernel(%arg0: i32, %arg1: memref<4x256xbf16, #tpu.memory_space<vmem>>, %arg2: memref<4x256x64xbf16, #tpu.memory_space<vmem>>, %arg3: memref<4x4x64xf32, #tpu.memory_space<vmem>>) attributes {dimension_semantics = [#tpu.dimension_semantics<parallel>], iteration_bounds = array<i64: 1>, scalar_prefetch = 0 : i64, scratch_operands = 0 : i64, tpu.core_type = #tpu.core_type<tc>, window_params = [{pipeline_mode = #tpu.pipeline_mode<synchronous>, transform_indices = @transform_0, window_bounds = array<i64: 4, 256>}, {transform_indices = @transform_1, window_bounds = array<i64: 4, 256, 64>}, {transform_indices = @transform_2, window_bounds = array<i64: 4, 4, 64>}]} {
    %c0 = arith.constant 0 : index
    %c0_0 = arith.constant 0 : index
    %0 = vector.load %arg1[%c0, %c0_0] : memref<4x256xbf16, #tpu.memory_space<vmem>>, vector<4x256xbf16>
    %c0_1 = arith.constant 0 : index
    %c0_2 = arith.constant 0 : index
    %c0_3 = arith.constant 0 : index
    %1 = vector.load %arg2[%c0_1, %c0_2, %c0_3] : memref<4x256x64xbf16, #tpu.memory_space<vmem>>, vector<1x256x64xbf16>
    %2 = vector.shape_cast %1 : vector<1x256x64xbf16> to vector<256x64xbf16>
    %cst = arith.constant dense<0.000000e+00> : vector<4x64xf32>
    %3 = tpu.matmul %0, %2, %cst {dimension_numbers = #tpu.dot_dimension_numbers<[1], [0], [0], [1], [0, 0, 1, 1], [], []>} : vector<4x256xbf16>, vector<256x64xbf16>, vector<4x64xf32> -> vector<4x64xf32>
    %4 = vector.extract_strided_slice %3 {offsets = [0, 0], sizes = [1, 64], strides = [1, 1]} : vector<4x64xf32> to vector<1x64xf32>
    %cst_4 = arith.constant 6.250000e-02 : f32
    %5 = vector.broadcast %cst_4 : f32 to vector<1x64xf32>
    %6 = arith.mulf %4, %5 : vector<1x64xf32>
    %c0_5 = arith.constant 0 : index
    %c0_6 = arith.constant 0 : index
    %c0_7 = arith.constant 0 : index
    %7 = vector.load %arg3[%c0_5, %c0_6, %c0_7] : memref<4x4x64xf32, #tpu.memory_space<vmem>>, vector<1x1x64xf32>
    %8 = vector.shape_cast %7 : vector<1x1x64xf32> to vector<1x64xf32>
    %9 = vector.shape_cast %6 : vector<1x64xf32> to vector<1x1x64xf32>
    tpu.vector_store %arg3[%c0_5, %c0_6, %c0_7], %9 {strides = array<i32>} : memref<4x4x64xf32, #tpu.memory_space<vmem>>, vector<1x1x64xf32>,
    %10 = vector.extract_strided_slice %3 {offsets = [1, 0], sizes = [1, 64], strides = [1, 1]} : vector<4x64xf32> to vector<1x64xf32>
    %cst_8 = arith.constant 1.562500e-02 : f32
    %11 = vector.broadcast %cst_8 : f32 to vector<1x64xf32>
    %12 = arith.mulf %10, %11 : vector<1x64xf32>
    %c1 = arith.constant 1 : index
    %c0_9 = arith.constant 0 : index
    %c0_10 = arith.constant 0 : index
    %13 = vector.load %arg3[%c1, %c0_9, %c0_10] : memref<4x4x64xf32, #tpu.memory_space<vmem>>, vector<1x1x64xf32>
    %14 = vector.shape_cast %13 : vector<1x1x64xf32> to vector<1x64xf32>
    %15 = vector.shape_cast %12 : vector<1x64xf32> to vector<1x1x64xf32>
    tpu.vector_store %arg3[%c1, %c0_9, %c0_10], %15 {strides = array<i32>} : memref<4x4x64xf32, #tpu.memory_space<vmem>>, vector<1x1x64xf32>,
    %16 = vector.extract_strided_slice %3 {offsets = [2, 0], sizes = [1, 64], strides = [1, 1]} : vector<4x64xf32> to vector<1x64xf32>
    %cst_11 = arith.constant 0.0069444445 : f32
    %17 = vector.broadcast %cst_11 : f32 to vector<1x64xf32>
    %18 = arith.mulf %16, %17 : vector<1x64xf32>
    %c2 = arith.constant 2 : index
    %c0_12 = arith.constant 0 : index
    %c0_13 = arith.constant 0 : index
    %19 = vector.load %arg3[%c2, %c0_12, %c0_13] : memref<4x4x64xf32, #tpu.memory_space<vmem>>, vector<1x1x64xf32>
    %20 = vector.shape_cast %19 : vector<1x1x64xf32> to vector<1x64xf32>
    %21 = vector.shape_cast %18 : vector<1x64xf32> to vector<1x1x64xf32>
    tpu.vector_store %arg3[%c2, %c0_12, %c0_13], %21 {strides = array<i32>} : memref<4x4x64xf32, #tpu.memory_space<vmem>>, vector<1x1x64xf32>,
    %22 = vector.extract_strided_slice %3 {offsets = [3, 0], sizes = [1, 64], strides = [1, 1]} : vector<4x64xf32> to vector<1x64xf32>
    %cst_14 = arith.constant 3.906250e-03 : f32
    %23 = vector.broadcast %cst_14 : f32 to vector<1x64xf32>
    %24 = arith.mulf %22, %23 : vector<1x64xf32>
    %c3 = arith.constant 3 : index
    %c0_15 = arith.constant 0 : index
    %c0_16 = arith.constant 0 : index
    %25 = vector.load %arg3[%c3, %c0_15, %c0_16] : memref<4x4x64xf32, #tpu.memory_space<vmem>>, vector<1x1x64xf32>
    %26 = vector.shape_cast %25 : vector<1x1x64xf32> to vector<1x64xf32>
    %27 = vector.shape_cast %24 : vector<1x64xf32> to vector<1x1x64xf32>
    tpu.vector_store %arg3[%c3, %c0_15, %c0_16], %27 {strides = array<i32>} : memref<4x4x64xf32, #tpu.memory_space<vmem>>, vector<1x1x64xf32>,
    %c1_17 = arith.constant 1 : index
    %c0_18 = arith.constant 0 : index
    %c0_19 = arith.constant 0 : index
    %28 = vector.load %arg2[%c1_17, %c0_18, %c0_19] : memref<4x256x64xbf16, #tpu.memory_space<vmem>>, vector<1x256x64xbf16>
    %29 = vector.shape_cast %28 : vector<1x256x64xbf16> to vector<256x64xbf16>
    %cst_20 = arith.constant dense<0.000000e+00> : vector<4x64xf32>
    %30 = tpu.matmul %0, %29, %cst_20 {dimension_numbers = #tpu.dot_dimension_numbers<[1], [0], [0], [1], [0, 0, 1, 1], [], []>} : vector<4x256xbf16>, vector<256x64xbf16>, vector<4x64xf32> -> vector<4x64xf32>
    %31 = vector.extract_strided_slice %30 {offsets = [0, 0], sizes = [1, 64], strides = [1, 1]} : vector<4x64xf32> to vector<1x64xf32>
    %cst_21 = arith.constant 6.250000e-02 : f32
    %32 = vector.broadcast %cst_21 : f32 to vector<1x64xf32>
    %33 = arith.mulf %31, %32 : vector<1x64xf32>
    %c0_22 = arith.constant 0 : index
    %c1_23 = arith.constant 1 : index
    %c0_24 = arith.constant 0 : index
    %34 = vector.load %arg3[%c0_22, %c1_23, %c0_24] : memref<4x4x64xf32, #tpu.memory_space<vmem>>, vector<1x1x64xf32>
    %35 = vector.shape_cast %34 : vector<1x1x64xf32> to vector<1x64xf32>
    %36 = vector.shape_cast %33 : vector<1x64xf32> to vector<1x1x64xf32>
    tpu.vector_store %arg3[%c0_22, %c1_23, %c0_24], %36 {strides = array<i32>} : memref<4x4x64xf32, #tpu.memory_space<vmem>>, vector<1x1x64xf32>,
    %37 = vector.extract_strided_slice %30 {offsets = [1, 0], sizes = [1, 64], strides = [1, 1]} : vector<4x64xf32> to vector<1x64xf32>
    %cst_25 = arith.constant 1.562500e-02 : f32
    %38 = vector.broadcast %cst_25 : f32 to vector<1x64xf32>
    %39 = arith.mulf %37, %38 : vector<1x64xf32>
    %c1_26 = arith.constant 1 : index
    %c1_27 = arith.constant 1 : index
    %c0_28 = arith.constant 0 : index
    %40 = vector.load %arg3[%c1_26, %c1_27, %c0_28] : memref<4x4x64xf32, #tpu.memory_space<vmem>>, vector<1x1x64xf32>
    %41 = vector.shape_cast %40 : vector<1x1x64xf32> to vector<1x64xf32>
    %42 = vector.shape_cast %39 : vector<1x64xf32> to vector<1x1x64xf32>
    tpu.vector_store %arg3[%c1_26, %c1_27, %c0_28], %42 {strides = array<i32>} : memref<4x4x64xf32, #tpu.memory_space<vmem>>, vector<1x1x64xf32>,
    %43 = vector.extract_strided_slice %30 {offsets = [2, 0], sizes = [1, 64], strides = [1, 1]} : vector<4x64xf32> to vector<1x64xf32>
    %cst_29 = arith.constant 0.0069444445 : f32
    %44 = vector.broadcast %cst_29 : f32 to vector<1x64xf32>
    %45 = arith.mulf %43, %44 : vector<1x64xf32>
    %c2_30 = arith.constant 2 : index
    %c1_31 = arith.constant 1 : index
    %c0_32 = arith.constant 0 : index
    %46 = vector.load %arg3[%c2_30, %c1_31, %c0_32] : memref<4x4x64xf32, #tpu.memory_space<vmem>>, vector<1x1x64xf32>
    %47 = vector.shape_cast %46 : vector<1x1x64xf32> to vector<1x64xf32>
    %48 = vector.shape_cast %45 : vector<1x64xf32> to vector<1x1x64xf32>
    tpu.vector_store %arg3[%c2_30, %c1_31, %c0_32], %48 {strides = array<i32>} : memref<4x4x64xf32, #tpu.memory_space<vmem>>, vector<1x1x64xf32>,
    %49 = vector.extract_strided_slice %30 {offsets = [3, 0], sizes = [1, 64], strides = [1, 1]} : vector<4x64xf32> to vector<1x64xf32>
    %cst_33 = arith.constant 3.906250e-03 : f32
    %50 = vector.broadcast %cst_33 : f32 to vector<1x64xf32>
    %51 = arith.mulf %49, %50 : vector<1x64xf32>
    %c3_34 = arith.constant 3 : index
    %c1_35 = arith.constant 1 : index
    %c0_36 = arith.constant 0 : index
    %52 = vector.load %arg3[%c3_34, %c1_35, %c0_36] : memref<4x4x64xf32, #tpu.memory_space<vmem>>, vector<1x1x64xf32>
    %53 = vector.shape_cast %52 : vector<1x1x64xf32> to vector<1x64xf32>
    %54 = vector.shape_cast %51 : vector<1x64xf32> to vector<1x1x64xf32>
    tpu.vector_store %arg3[%c3_34, %c1_35, %c0_36], %54 {strides = array<i32>} : memref<4x4x64xf32, #tpu.memory_space<vmem>>, vector<1x1x64xf32>,
    %c2_37 = arith.constant 2 : index
    %c0_38 = arith.constant 0 : index
    %c0_39 = arith.constant 0 : index
    %55 = vector.load %arg2[%c2_37, %c0_38, %c0_39] : memref<4x256x64xbf16, #tpu.memory_space<vmem>>, vector<1x256x64xbf16>
    %56 = vector.shape_cast %55 : vector<1x256x64xbf16> to vector<256x64xbf16>
    %cst_40 = arith.constant dense<0.000000e+00> : vector<4x64xf32>
    %57 = tpu.matmul %0, %56, %cst_40 {dimension_numbers = #tpu.dot_dimension_numbers<[1], [0], [0], [1], [0, 0, 1, 1], [], []>} : vector<4x256xbf16>, vector<256x64xbf16>, vector<4x64xf32> -> vector<4x64xf32>
    %58 = vector.extract_strided_slice %57 {offsets = [0, 0], sizes = [1, 64], strides = [1, 1]} : vector<4x64xf32> to vector<1x64xf32>
    %cst_41 = arith.constant 6.250000e-02 : f32
    %59 = vector.broadcast %cst_41 : f32 to vector<1x64xf32>
    %60 = arith.mulf %58, %59 : vector<1x64xf32>
    %c0_42 = arith.constant 0 : index
    %c2_43 = arith.constant 2 : index
    %c0_44 = arith.constant 0 : index
    %61 = vector.load %arg3[%c0_42, %c2_43, %c0_44] : memref<4x4x64xf32, #tpu.memory_space<vmem>>, vector<1x1x64xf32>
    %62 = vector.shape_cast %61 : vector<1x1x64xf32> to vector<1x64xf32>
    %63 = vector.shape_cast %60 : vector<1x64xf32> to vector<1x1x64xf32>
    tpu.vector_store %arg3[%c0_42, %c2_43, %c0_44], %63 {strides = array<i32>} : memref<4x4x64xf32, #tpu.memory_space<vmem>>, vector<1x1x64xf32>,
    %64 = vector.extract_strided_slice %57 {offsets = [1, 0], sizes = [1, 64], strides = [1, 1]} : vector<4x64xf32> to vector<1x64xf32>
    %cst_45 = arith.constant 1.562500e-02 : f32
    %65 = vector.broadcast %cst_45 : f32 to vector<1x64xf32>
    %66 = arith.mulf %64, %65 : vector<1x64xf32>
    %c1_46 = arith.constant 1 : index
    %c2_47 = arith.constant 2 : index
    %c0_48 = arith.constant 0 : index
    %67 = vector.load %arg3[%c1_46, %c2_47, %c0_48] : memref<4x4x64xf32, #tpu.memory_space<vmem>>, vector<1x1x64xf32>
    %68 = vector.shape_cast %67 : vector<1x1x64xf32> to vector<1x64xf32>
    %69 = vector.shape_cast %66 : vector<1x64xf32> to vector<1x1x64xf32>
    tpu.vector_store %arg3[%c1_46, %c2_47, %c0_48], %69 {strides = array<i32>} : memref<4x4x64xf32, #tpu.memory_space<vmem>>, vector<1x1x64xf32>,
    %70 = vector.extract_strided_slice %57 {offsets = [2, 0], sizes = [1, 64], strides = [1, 1]} : vector<4x64xf32> to vector<1x64xf32>
    %cst_49 = arith.constant 0.0069444445 : f32
    %71 = vector.broadcast %cst_49 : f32 to vector<1x64xf32>
    %72 = arith.mulf %70, %71 : vector<1x64xf32>
    %c2_50 = arith.constant 2 : index
    %c2_51 = arith.constant 2 : index
    %c0_52 = arith.constant 0 : index
    %73 = vector.load %arg3[%c2_50, %c2_51, %c0_52] : memref<4x4x64xf32, #tpu.memory_space<vmem>>, vector<1x1x64xf32>
    %74 = vector.shape_cast %73 : vector<1x1x64xf32> to vector<1x64xf32>
    %75 = vector.shape_cast %72 : vector<1x64xf32> to vector<1x1x64xf32>
    tpu.vector_store %arg3[%c2_50, %c2_51, %c0_52], %75 {strides = array<i32>} : memref<4x4x64xf32, #tpu.memory_space<vmem>>, vector<1x1x64xf32>,
    %76 = vector.extract_strided_slice %57 {offsets = [3, 0], sizes = [1, 64], strides = [1, 1]} : vector<4x64xf32> to vector<1x64xf32>
    %cst_53 = arith.constant 3.906250e-03 : f32
    %77 = vector.broadcast %cst_53 : f32 to vector<1x64xf32>
    %78 = arith.mulf %76, %77 : vector<1x64xf32>
    %c3_54 = arith.constant 3 : index
    %c2_55 = arith.constant 2 : index
    %c0_56 = arith.constant 0 : index
    %79 = vector.load %arg3[%c3_54, %c2_55, %c0_56] : memref<4x4x64xf32, #tpu.memory_space<vmem>>, vector<1x1x64xf32>
    %80 = vector.shape_cast %79 : vector<1x1x64xf32> to vector<1x64xf32>
    %81 = vector.shape_cast %78 : vector<1x64xf32> to vector<1x1x64xf32>
    tpu.vector_store %arg3[%c3_54, %c2_55, %c0_56], %81 {strides = array<i32>} : memref<4x4x64xf32, #tpu.memory_space<vmem>>, vector<1x1x64xf32>,
    %c3_57 = arith.constant 3 : index
    %c0_58 = arith.constant 0 : index
    %c0_59 = arith.constant 0 : index
    %82 = vector.load %arg2[%c3_57, %c0_58, %c0_59] : memref<4x256x64xbf16, #tpu.memory_space<vmem>>, vector<1x256x64xbf16>
    %83 = vector.shape_cast %82 : vector<1x256x64xbf16> to vector<256x64xbf16>
    %cst_60 = arith.constant dense<0.000000e+00> : vector<4x64xf32>
    %84 = tpu.matmul %0, %83, %cst_60 {dimension_numbers = #tpu.dot_dimension_numbers<[1], [0], [0], [1], [0, 0, 1, 1], [], []>} : vector<4x256xbf16>, vector<256x64xbf16>, vector<4x64xf32> -> vector<4x64xf32>
    %85 = vector.extract_strided_slice %84 {offsets = [0, 0], sizes = [1, 64], strides = [1, 1]} : vector<4x64xf32> to vector<1x64xf32>
    %cst_61 = arith.constant 6.250000e-02 : f32
    %86 = vector.broadcast %cst_61 : f32 to vector<1x64xf32>
    %87 = arith.mulf %85, %86 : vector<1x64xf32>
    %c0_62 = arith.constant 0 : index
    %c3_63 = arith.constant 3 : index
    %c0_64 = arith.constant 0 : index
    %88 = vector.load %arg3[%c0_62, %c3_63, %c0_64] : memref<4x4x64xf32, #tpu.memory_space<vmem>>, vector<1x1x64xf32>
    %89 = vector.shape_cast %88 : vector<1x1x64xf32> to vector<1x64xf32>
    %90 = vector.shape_cast %87 : vector<1x64xf32> to vector<1x1x64xf32>
    tpu.vector_store %arg3[%c0_62, %c3_63, %c0_64], %90 {strides = array<i32>} : memref<4x4x64xf32, #tpu.memory_space<vmem>>, vector<1x1x64xf32>,
    %91 = vector.extract_strided_slice %84 {offsets = [1, 0], sizes = [1, 64], strides = [1, 1]} : vector<4x64xf32> to vector<1x64xf32>
    %cst_65 = arith.constant 1.562500e-02 : f32
    %92 = vector.broadcast %cst_65 : f32 to vector<1x64xf32>
    %93 = arith.mulf %91, %92 : vector<1x64xf32>
    %c1_66 = arith.constant 1 : index
    %c3_67 = arith.constant 3 : index
    %c0_68 = arith.constant 0 : index
    %94 = vector.load %arg3[%c1_66, %c3_67, %c0_68] : memref<4x4x64xf32, #tpu.memory_space<vmem>>, vector<1x1x64xf32>
    %95 = vector.shape_cast %94 : vector<1x1x64xf32> to vector<1x64xf32>
    %96 = vector.shape_cast %93 : vector<1x64xf32> to vector<1x1x64xf32>
    tpu.vector_store %arg3[%c1_66, %c3_67, %c0_68], %96 {strides = array<i32>} : memref<4x4x64xf32, #tpu.memory_space<vmem>>, vector<1x1x64xf32>,
    %97 = vector.extract_strided_slice %84 {offsets = [2, 0], sizes = [1, 64], strides = [1, 1]} : vector<4x64xf32> to vector<1x64xf32>
    %cst_69 = arith.constant 0.0069444445 : f32
    %98 = vector.broadcast %cst_69 : f32 to vector<1x64xf32>
    %99 = arith.mulf %97, %98 : vector<1x64xf32>
    %c2_70 = arith.constant 2 : index
    %c3_71 = arith.constant 3 : index
    %c0_72 = arith.constant 0 : index
    %100 = vector.load %arg3[%c2_70, %c3_71, %c0_72] : memref<4x4x64xf32, #tpu.memory_space<vmem>>, vector<1x1x64xf32>
    %101 = vector.shape_cast %100 : vector<1x1x64xf32> to vector<1x64xf32>
    %102 = vector.shape_cast %99 : vector<1x64xf32> to vector<1x1x64xf32>
    tpu.vector_store %arg3[%c2_70, %c3_71, %c0_72], %102 {strides = array<i32>} : memref<4x4x64xf32, #tpu.memory_space<vmem>>, vector<1x1x64xf32>,
    %103 = vector.extract_strided_slice %84 {offsets = [3, 0], sizes = [1, 64], strides = [1, 1]} : vector<4x64xf32> to vector<1x64xf32>
    %cst_73 = arith.constant 3.906250e-03 : f32
    %104 = vector.broadcast %cst_73 : f32 to vector<1x64xf32>
    %105 = arith.mulf %103, %104 : vector<1x64xf32>
    %c3_74 = arith.constant 3 : index
    %c3_75 = arith.constant 3 : index
    %c0_76 = arith.constant 0 : index
    %106 = vector.load %arg3[%c3_74, %c3_75, %c0_76] : memref<4x4x64xf32, #tpu.memory_space<vmem>>, vector<1x1x64xf32>
    %107 = vector.shape_cast %106 : vector<1x1x64xf32> to vector<1x64xf32>
    %108 = vector.shape_cast %105 : vector<1x64xf32> to vector<1x1x64xf32>
    tpu.vector_store %arg3[%c3_74, %c3_75, %c0_76], %108 {strides = array<i32>} : memref<4x4x64xf32, #tpu.memory_space<vmem>>, vector<1x1x64xf32>,
    return
  }
  func.func @transform_0(%arg0: i32) -> (i32, i32) {
    %c0_i32 = arith.constant 0 : i32
    %c0_i32_0 = arith.constant 0 : i32
    %c0_i32_1 = arith.constant 0 : i32
    return %c0_i32, %c0_i32_0 : i32, i32
  }
  func.func @transform_1(%arg0: i32) -> (i32, i32, i32) {
    %c0_i32 = arith.constant 0 : i32
    %c0_i32_0 = arith.constant 0 : i32
    %c0_i32_1 = arith.constant 0 : i32
    return %arg0, %c0_i32, %c0_i32_0 : i32, i32, i32
  }
  func.func @transform_2(%arg0: i32) -> (i32, i32, i32) {
    %c0_i32 = arith.constant 0 : i32
    %c0_i32_0 = arith.constant 0 : i32
    %c0_i32_1 = arith.constant 0 : i32
    return %c0_i32, %arg0, %c0_i32_0 : i32, i32, i32
  }
}

module attributes {stable_mosaic.version = 11 : i64} {
  func.func @_classblock_kernel(%arg0: i32, %arg1: memref<1x4x64xf32, #tpu.memory_space<vmem>>, %arg2: memref<1x64x32xbf16, #tpu.memory_space<vmem>>, %arg3: memref<1x1x32xf32, #tpu.memory_space<vmem>>, %arg4: memref<1x32x128xbf16, #tpu.memory_space<vmem>>, %arg5: memref<1x1x128xf32, #tpu.memory_space<vmem>>, %arg6: memref<1x4x128xf32, #tpu.memory_space<vmem>>) attributes {dimension_semantics = [#tpu.dimension_semantics<parallel>], iteration_bounds = array<i64: 4>, scalar_prefetch = 0 : i64, scratch_operands = 0 : i64, tpu.core_type = #tpu.core_type<tc>, window_params = [{transform_indices = @transform_0, window_bounds = array<i64: 1, 4, 64>}, {transform_indices = @transform_1, window_bounds = array<i64: 1, 64, 32>}, {transform_indices = @transform_2, window_bounds = array<i64: 1, 1, 32>}, {transform_indices = @transform_3, window_bounds = array<i64: 1, 32, 128>}, {transform_indices = @transform_4, window_bounds = array<i64: 1, 1, 128>}, {transform_indices = @transform_5, window_bounds = array<i64: 1, 4, 128>}]} {
    %c0 = arith.constant 0 : index
    %c0_0 = arith.constant 0 : index
    %c0_1 = arith.constant 0 : index
    %0 = vector.load %arg1[%c0, %c0_0, %c0_1] : memref<1x4x64xf32, #tpu.memory_space<vmem>>, vector<1x4x64xf32>
    %1 = vector.shape_cast %0 : vector<1x4x64xf32> to vector<4x64xf32>
    %2 = arith.truncf %1 : vector<4x64xf32> to vector<4x64xbf16>
    %c0_2 = arith.constant 0 : index
    %c0_3 = arith.constant 0 : index
    %c0_4 = arith.constant 0 : index
    %3 = vector.load %arg2[%c0_2, %c0_3, %c0_4] : memref<1x64x32xbf16, #tpu.memory_space<vmem>>, vector<1x64x32xbf16>
    %4 = vector.shape_cast %3 : vector<1x64x32xbf16> to vector<64x32xbf16>
    %cst = arith.constant dense<0.000000e+00> : vector<4x32xf32>
    %5 = tpu.matmul %2, %4, %cst {dimension_numbers = #tpu.dot_dimension_numbers<[1], [0], [0], [1], [0, 0, 1, 1], [], []>} : vector<4x64xbf16>, vector<64x32xbf16>, vector<4x32xf32> -> vector<4x32xf32>
    %c0_5 = arith.constant 0 : index
    %c0_6 = arith.constant 0 : index
    %c0_7 = arith.constant 0 : index
    %6 = vector.load %arg3[%c0_5, %c0_6, %c0_7] : memref<1x1x32xf32, #tpu.memory_space<vmem>>, vector<1x1x32xf32>
    %7 = vector.shape_cast %6 : vector<1x1x32xf32> to vector<1x32xf32>
    %8 = vector.broadcast %7 : vector<1x32xf32> to vector<4x32xf32>
    %9 = arith.addf %5, %8 : vector<4x32xf32>
    %10 = arith.truncf %9 : vector<4x32xf32> to vector<4x32xbf16>
    %c0_8 = arith.constant 0 : index
    %c0_9 = arith.constant 0 : index
    %c0_10 = arith.constant 0 : index
    %11 = vector.load %arg4[%c0_8, %c0_9, %c0_10] : memref<1x32x128xbf16, #tpu.memory_space<vmem>>, vector<1x32x128xbf16>
    %12 = vector.shape_cast %11 : vector<1x32x128xbf16> to vector<32x128xbf16>
    %cst_11 = arith.constant dense<0.000000e+00> : vector<4x128xf32>
    %13 = tpu.matmul %10, %12, %cst_11 {dimension_numbers = #tpu.dot_dimension_numbers<[1], [0], [0], [1], [0, 0, 1, 1], [], []>} : vector<4x32xbf16>, vector<32x128xbf16>, vector<4x128xf32> -> vector<4x128xf32>
    %c0_12 = arith.constant 0 : index
    %c0_13 = arith.constant 0 : index
    %c0_14 = arith.constant 0 : index
    %14 = vector.load %arg5[%c0_12, %c0_13, %c0_14] : memref<1x1x128xf32, #tpu.memory_space<vmem>>, vector<1x1x128xf32>
    %15 = vector.shape_cast %14 : vector<1x1x128xf32> to vector<1x128xf32>
    %16 = vector.broadcast %15 : vector<1x128xf32> to vector<4x128xf32>
    %17 = arith.addf %13, %16 : vector<4x128xf32>
    %c0_15 = arith.constant 0 : index
    %c0_16 = arith.constant 0 : index
    %c0_17 = arith.constant 0 : index
    %18 = vector.load %arg6[%c0_15, %c0_16, %c0_17] : memref<1x4x128xf32, #tpu.memory_space<vmem>>, vector<1x4x128xf32>
    %19 = vector.shape_cast %18 : vector<1x4x128xf32> to vector<4x128xf32>
    %20 = vector.shape_cast %17 : vector<4x128xf32> to vector<1x4x128xf32>
    tpu.vector_store %arg6[%c0_15, %c0_16, %c0_17], %20 {strides = array<i32>} : memref<1x4x128xf32, #tpu.memory_space<vmem>>, vector<1x4x128xf32>,
    return
  }
  func.func @transform_0(%arg0: i32) -> (i32, i32, i32) {
    %c0_i32 = arith.constant 0 : i32
    %c0_i32_0 = arith.constant 0 : i32
    %c0_i32_1 = arith.constant 0 : i32
    return %arg0, %c0_i32, %c0_i32_0 : i32, i32, i32
  }
  func.func @transform_1(%arg0: i32) -> (i32, i32, i32) {
    %c0_i32 = arith.constant 0 : i32
    %c0_i32_0 = arith.constant 0 : i32
    %c0_i32_1 = arith.constant 0 : i32
    return %arg0, %c0_i32, %c0_i32_0 : i32, i32, i32
  }
  func.func @transform_2(%arg0: i32) -> (i32, i32, i32) {
    %c0_i32 = arith.constant 0 : i32
    %c0_i32_0 = arith.constant 0 : i32
    %c0_i32_1 = arith.constant 0 : i32
    return %arg0, %c0_i32, %c0_i32_0 : i32, i32, i32
  }
  func.func @transform_3(%arg0: i32) -> (i32, i32, i32) {
    %c0_i32 = arith.constant 0 : i32
    %c0_i32_0 = arith.constant 0 : i32
    %c0_i32_1 = arith.constant 0 : i32
    return %arg0, %c0_i32, %c0_i32_0 : i32, i32, i32
  }
  func.func @transform_4(%arg0: i32) -> (i32, i32, i32) {
    %c0_i32 = arith.constant 0 : i32
    %c0_i32_0 = arith.constant 0 : i32
    %c0_i32_1 = arith.constant 0 : i32
    return %arg0, %c0_i32, %c0_i32_0 : i32, i32, i32
  }
  func.func @transform_5(%arg0: i32) -> (i32, i32, i32) {
    %c0_i32 = arith.constant 0 : i32
    %c0_i32_0 = arith.constant 0 : i32
    %c0_i32_1 = arith.constant 0 : i32
    return %arg0, %c0_i32, %c0_i32_0 : i32, i32, i32
  }
}

</mosaic_0001>

<bundles_post_ra>
// kernel: lpn_forward.3
= control target key start
LH: loop header
LB: loop body
LE: loop exit
PB: predicated region body
PF: predicated region fallthrough
CT: control target
= control target key end

     0   :  { %s647_s18 = smov 0   ;;  %s687_s0 = inlined_call_operand.vmem [shape: f32[4,4,64], index: 0, kind: input, shape index: {}]   ;;  %s688_s1 = inlined_call_operand.vmem [shape: bf16[4,64,32], index: 1, kind: input, shape index: {}]   ;;  %s689_s2 = inlined_call_operand.vmem [shape: f32[4,1,32], index: 2, kind: input, shape index: {}]   ;;  %s690_s3 = inlined_call_operand.vmem [shape: bf16[4,32,128], index: 3, kind: input, shape index: {}]   ;;  %s691_s4 = inlined_call_operand.vmem [shape: f32[4,1,128], index: 4, kind: input, shape index: {}]   ;;  %s692_s5 = inlined_call_operand.vmem [shape: f32[4,4,128], index: 5, kind: output, shape index: {}]  }
   0x1 LB: > { %s538_s19 = sadd.s32 4294967295, %s613_s18   ;;  %p542_p0 = scmp.ge.s32.totalorder %s613_s18, 1  ;;  %s613_s18 = sphi %s647_s18, %s15_s18  }
   0x2   : > { %p222_p1 = scmp.lt.s32.totalorder %s613_s18, 5 }
   0x4   : > { %p223_p2 = pnand %p542_p0, %p222_p1 }
   0x5   : > { %p264_p3 = scmp.lt.s32.totalorder (!%p223_p2), %s538_s19, 3  ;;  %v615_v0 = vmov (!%p223_p2), 0.0   ;;  %vm616_vm0 = vmmov (!%p223_p2), 0   ;;  %vm330_vm1 = vcmask (!%p223_p2), 523264   ;;  %vm398_vm2 = vcmask (!%p223_p2), 261120  }
   0x6   : > { %226 = sbr.rel (%p223_p2) target bundleno = 463 (0x1cf), region = 40  ;;  %571 = vmatprep.subr.bf16.mxu0 (!%p223_p2), %v615_v0  ;;  %579 = vmatprep.mubr.msk.bf16.mxu0 (!%p223_p2), %vm616_vm0, %v615_v0 }
   0x7   : > { %583 = vmatprep.subr.bf16.mxu1 (!%p223_p2), %v615_v0  ;;  %587 = vmatprep.mubr.msk.bf16.mxu1 (!%p223_p2), %vm616_vm0, %v615_v0 }
   0xd   : > { %s694_s19 = smov (!%p264_p3, %s538_s19), 3 }
   0xe   : > { %s561_s20 = sshll.u32 %s694_s19, 5  ;;  %s562_s24 = sshll.u32 %s694_s19, 4 }
   0xf   : > { %s272_s23 = scalar_lea.vmem %s688_s1, %s561_s20  ;;  %s280_s27 = scalar_lea.vmem %s690_s3, %s562_s24 }
  0x10   : > { %v601_v1 = vld [vmem:[%s272_s23] sm:$0xff]   ;;  %v602_v2 = vld [vmem:[%s272_s23 + $0x8] sm:$0xff]   ;;  %s543_s28 = sshll.u32 %s694_s19, 2  ;;  %v603_v4 = vld [vmem:[%s272_s23 + $0x10] sm:$0xff]   ;;  %s275_s9 = scalar_lea.vmem %s689_s2, %s694_s19 }
  0x11   : > { %572 = vmatpush3.bf16.msra.mxu0 %v601_v1  ;;  %v605_v3 = vld [vmem:[%s280_s27] sm:$0xff]   ;;  %s267_s6 = scalar_lea.vmem %s687_s0, %s543_s28  ;;  %v604_v5 = vld [vmem:[%s272_s23 + $0x18] sm:$0xff]   ;;  %v606_v8 = vld [vmem:[%s280_s27 + $0x8] sm:$0xff]   ;;  %s283_s12 = scalar_lea.vmem %s691_s4, %s694_s19 }
  0x12   : > { %573 = vmatprep.subr.bf16.mxu0 %v615_v0  ;;  %584 = vmatpush3.bf16.msra.mxu1 %v605_v3  ;;  %v289_v6 = vld [vmem:[%s267_s6] sm:$0xf]  ;;  %s287_s15 = scalar_lea.vmem %s692_s5, %s543_s28 }
  0x13   : > { %585 = vmatprep.subr.bf16.mxu1 %v615_v0  ;;  %v290_v7 = vpack.c.bf16 %v289_v6, %v289_v6  ;;  %v549_v9 = vld [vmem:[%s275_s9] ss:$0 sm:$0xff] }
  0x14   : > { %v555_v16 = vld [vmem:[%s283_s12] ss:$0 sm:$0xff] }
  0x15   : > { %574 = vmatpush3.bf16.msra.mxu0 %v602_v2 }
  0x16   : > { %575 = vmatprep.subr.bf16.mxu0 %v615_v0  ;;  %586 = vmatpush3.bf16.msra.mxu1 %v606_v8 }
  0x19   : > { %576 = vmatpush3.bf16.msra.mxu0 %v603_v4 }
  0x1a   : > { %577 = vmatprep.subr.bf16.mxu0 %v615_v0 }
  0x1d   : > { %578 = vmatpush3.bf16.msra.mxu0 %v604_v5 }
  0x20   : > { %580 = vmatmul.mubr.msk.bf16.vlgmr.msra.gmra.mrb[0].mxu0 %vm330_vm1, %v290_v7 }
  0xf3   : > { %v368_v10 = vpop.f32.mrb[0].mxu0 }
  0xf4   : > { %v369_v11 = vadd.f32 %v549_v9, %v368_v10  ;;  %v581_v12 = vpop.f32.mrb[1].mxu0 }
  0xf5   : > { %v371_v13 = vpop.f32.mrb[2].mxu0 }
  0xf6   : > { %v374_v14 = vpack.c.bf16 %v369_v11, %v369_v11  ;;  %v582_v15 = vpop.f32.mrb[3].mxu0 }
  0xf8   : > { %588 = vmatmul.mubr.msk.bf16.vlgmr.msra.gmra.mrb[0].mxu1 %vm398_vm2, %v374_v14 }
 0x1cb   : > { %v436_v17 = vpop.f32.mrb[0].mxu1 }
 0x1cc   : > { %v437_v18 = vadd.f32 %v555_v16, %v436_v17  ;;  %v589_v19 = vpop.f32.mrb[1].mxu1 }
 0x1cd   : > { %v439_v20 = vpop.f32.mrb[2].mxu1 }
 0x1ce   : > { %442 = vst [vmem:[%s287_s15] sm:$0xf] %v437_v18  ;;  %v590_v21 = vpop.f32.mrb[3].mxu1 }
 0x1cf PF: > { %s15_s18 = sadd.s32 1, %s613_s18  }
 0x1d0   : > { %p12_p4 = scmp.ge.s32.totalorder %s15_s18, 6  }
 0x1d2   :  { %14 = sbr.rel (!%p12_p4) target bundleno = 1 (0x1), region = 82 }

// kernel: lpn_forward.2
= control target key start
LH: loop header
LB: loop body
LE: loop exit
PB: predicated region body
PF: predicated region fallthrough
CT: control target
= control target key end

     0   :  { %vm193_vm0 = vcmask 516096   ;;  %vm197_vm1 = vcmask 517121   ;;  %vm201_vm2 = vcmask 518146   ;;  %vm205_vm3 = vcmask 519171   ;;  %s1349_s1 = inlined_call_operand.vmem [shape: bf16[4,256,64], index: 1, kind: input, shape index: {}]   ;;  %s1350_s0 = inlined_call_operand.vmem [shape: bf16[4,256], index: 0, kind: input, shape index: {}]   ;;  %s1351_s2 = inlined_call_operand.vmem [shape: f32[4,4,64], index: 2, kind: output, shape index: {}]  }
   0x1   :  { %v1003_v0 = vld [vmem:[%s1349_s1 + $0x40] sm:$0xff]   ;;  %v1007_v4 = vld [vmem:[%s1349_s1 + $0x48] sm:$0xff]   ;;  %v1011_v8 = vld [vmem:[%s1349_s1 + $0x50] sm:$0xff]  }
   0x2   :  { %v1004_v1 = vld [vmem:[%s1349_s1 + $0xc0] sm:$0xff]   ;;  %915 = vmatprep.subr.bf16.mxu0 %v1003_v0  ;;  %v1008_v5 = vld [vmem:[%s1349_s1 + $0xc8] sm:$0xff]   ;;  %v1012_v9 = vld [vmem:[%s1349_s1 + $0xd0] sm:$0xff]  }
   0x3   :  { %v1005_v2 = vld [vmem:[%s1349_s1] sm:$0xff]   ;;  %937 = vmatprep.subr.bf16.mxu1 %v1004_v1  ;;  %v1009_v6 = vld [vmem:[%s1349_s1 + $0x8] sm:$0xff]   ;;  %v1013_v10 = vld [vmem:[%s1349_s1 + $0x10] sm:$0xff]  }
   0x4   :  { %v1006_v3 = vld [vmem:[%s1349_s1 + $0x80] sm:$0xff]   ;;  %916 = vmatpush3.bf16.msra.mxu0 %v1005_v2  ;;  %v1010_v7 = vld [vmem:[%s1349_s1 + $0x88] sm:$0xff]   ;;  %v1014_v11 = vld [vmem:[%s1349_s1 + $0x90] sm:$0xff]  }
   0x5   :  { %938 = vmatpush3.bf16.msra.mxu1 %v1006_v3  ;;  %917 = vmatprep.subr.bf16.mxu0 %v1007_v4  ;;  %v1015_v12 = vld [vmem:[%s1349_s1 + $0x58] sm:$0xff]   ;;  %v1019_v16 = vld [vmem:[%s1349_s1 + $0x60] sm:$0xff]   ;;  %v1023_v20 = vld [vmem:[%s1349_s1 + $0x68] sm:$0xff]  }
   0x6   :  { %939 = vmatprep.subr.bf16.mxu1 %v1008_v5  ;;  %v1016_v13 = vld [vmem:[%s1349_s1 + $0xd8] sm:$0xff]   ;;  %v1020_v17 = vld [vmem:[%s1349_s1 + $0xe0] sm:$0xff]   ;;  %v1024_v21 = vld [vmem:[%s1349_s1 + $0xe8] sm:$0xff]  }
   0x7   :  { %v1017_v14 = vld [vmem:[%s1349_s1 + $0x18] sm:$0xff]   ;;  %v1021_v18 = vld [vmem:[%s1349_s1 + $0x20] sm:$0xff]   ;;  %v1025_v22 = vld [vmem:[%s1349_s1 + $0x28] sm:$0xff]  }
   0x8   :  { %918 = vmatpush3.bf16.msra.mxu0 %v1009_v6  ;;  %v1018_v15 = vld [vmem:[%s1349_s1 + $0x98] sm:$0xff]   ;;  %v1022_v19 = vld [vmem:[%s1349_s1 + $0xa0] sm:$0xff]   ;;  %v1026_v23 = vld [vmem:[%s1349_s1 + $0xa8] sm:$0xff]  }
   0x9   :  { %940 = vmatpush3.bf16.msra.mxu1 %v1010_v7  ;;  %919 = vmatprep.subr.bf16.mxu0 %v1011_v8  ;;  %v1027_v24 = vld [vmem:[%s1349_s1 + $0x70] sm:$0xff]   ;;  %v1031_v28 = vld [vmem:[%s1349_s1 + $0x78] sm:$0xff]   ;;  %v1181_v32 = vld.sshfl [vmem:[%s1350_s0] sm:$0x33 pattern:$0x76325410] }
   0xa   :  { %941 = vmatprep.subr.bf16.mxu1 %v1012_v9  ;;  %v1028_v25 = vld [vmem:[%s1349_s1 + $0xf0] sm:$0xff]   ;;  %v1032_v29 = vld [vmem:[%s1349_s1 + $0xf8] sm:$0xff]   ;;  %v53_v33 = vcombine.high %v1181_v32, %v1181_v32  ;;  %v1035_v34 = vld [vmem:[%s1349_s1 + $0x140] sm:$0xff]  }
   0xb   :  { %v1029_v26 = vld [vmem:[%s1349_s1 + $0x30] sm:$0xff]   ;;  %v1033_v30 = vld [vmem:[%s1349_s1 + $0x38] sm:$0xff]   ;;  %v1036_v35 = vld [vmem:[%s1349_s1 + $0x1c0] sm:$0xff]  }
   0xc   :  { %920 = vmatpush3.bf16.msra.mxu0 %v1013_v10  ;;  %v1030_v27 = vld [vmem:[%s1349_s1 + $0xb0] sm:$0xff]   ;;  %v1034_v31 = vld [vmem:[%s1349_s1 + $0xb8] sm:$0xff]   ;;  %184 = vmatprep.mubr.bf16.mxu0 %v53_v33  ;;  %v1037_v36 = vld [vmem:[%s1349_s1 + $0x100] sm:$0xff]  }
   0xd   :  { %942 = vmatpush3.bf16.msra.mxu1 %v1014_v11  ;;  %921 = vmatprep.subr.bf16.mxu0 %v1015_v12  ;;  %v1038_v37 = vld [vmem:[%s1349_s1 + $0x180] sm:$0xff]   ;;  %v1039_v38 = vld [vmem:[%s1349_s1 + $0x148] sm:$0xff]   ;;  %v1043_v42 = vld [vmem:[%s1349_s1 + $0x150] sm:$0xff]  }
   0xe   :  { %943 = vmatprep.subr.bf16.mxu1 %v1016_v13  ;;  %368 = vmatprep.mubr.bf16.mxu1 %v53_v33  ;;  %v1040_v39 = vld [vmem:[%s1349_s1 + $0x1c8] sm:$0xff]   ;;  %v1044_v43 = vld [vmem:[%s1349_s1 + $0x1d0] sm:$0xff]   ;;  %v1047_v46 = vld [vmem:[%s1349_s1 + $0x158] sm:$0xff]  }
   0xf   :  { %v1041_v40 = vld [vmem:[%s1349_s1 + $0x108] sm:$0xff]   ;;  %v1045_v44 = vld [vmem:[%s1349_s1 + $0x110] sm:$0xff]   ;;  %v1048_v47 = vld [vmem:[%s1349_s1 + $0x1d8] sm:$0xff]  }
  0x10   :  { %922 = vmatpush3.bf16.msra.mxu0 %v1017_v14  ;;  %v1042_v41 = vld [vmem:[%s1349_s1 + $0x188] sm:$0xff]   ;;  %v1046_v45 = vld [vmem:[%s1349_s1 + $0x190] sm:$0xff]   ;;  %v1049_v48 = vld [vmem:[%s1349_s1 + $0x118] sm:$0xff]  }
  0x11   :  { %944 = vmatpush3.bf16.msra.mxu1 %v1018_v15  ;;  %923 = vmatprep.subr.bf16.mxu0 %v1019_v16  ;;  %v1050_v49 = vld [vmem:[%s1349_s1 + $0x198] sm:$0xff]   ;;  %v1051_v50 = vld [vmem:[%s1349_s1 + $0x160] sm:$0xff]   ;;  %v1055_v54 = vld [vmem:[%s1349_s1 + $0x168] sm:$0xff]  }
  0x12   :  { %945 = vmatprep.subr.bf16.mxu1 %v1020_v17  ;;  %v1052_v51 = vld [vmem:[%s1349_s1 + $0x1e0] sm:$0xff]   ;;  %v1056_v55 = vld [vmem:[%s1349_s1 + $0x1e8] sm:$0xff]   ;;  %v1059_v58 = vld [vmem:[%s1349_s1 + $0x170] sm:$0xff]  }
  0x13   :  { %v1053_v52 = vld [vmem:[%s1349_s1 + $0x120] sm:$0xff]   ;;  %v1057_v56 = vld [vmem:[%s1349_s1 + $0x128] sm:$0xff]   ;;  %v1060_v59 = vld [vmem:[%s1349_s1 + $0x1f0] sm:$0xff]  }
  0x14   :  { %924 = vmatpush3.bf16.msra.mxu0 %v1021_v18  ;;  %v1054_v53 = vld [vmem:[%s1349_s1 + $0x1a0] sm:$0xff]   ;;  %v1058_v57 = vld [vmem:[%s1349_s1 + $0x1a8] sm:$0xff]   ;;  %v1061_v60 = vld [vmem:[%s1349_s1 + $0x130] sm:$0xff]  }
  0x15   :  { %946 = vmatpush3.bf16.msra.mxu1 %v1022_v19  ;;  %925 = vmatprep.subr.bf16.mxu0 %v1023_v20  ;;  %v1062_v61 = vld [vmem:[%s1349_s1 + $0x1b0] sm:$0xff]   ;;  %v1063_v62 = vld [vmem:[%s1349_s1 + $0x178] sm:$0xff]  }
  0x16   :  { %947 = vmatprep.subr.bf16.mxu1 %v1024_v21  ;;  %v1064_v63 = vld [vmem:[%s1349_s1 + $0x1f8] sm:$0xff]  }
  0x17   :  { %v1065_v0 = vld [vmem:[%s1349_s1 + $0x138] sm:$0xff]  }
  0x18   :  { %926 = vmatpush3.bf16.msra.mxu0 %v1025_v22  ;;  %v1066_v1 = vld [vmem:[%s1349_s1 + $0x1b8] sm:$0xff]  }
  0x19   :  { %948 = vmatpush3.bf16.msra.mxu1 %v1026_v23  ;;  %927 = vmatprep.subr.bf16.mxu0 %v1027_v24 }
  0x1a   :  { %949 = vmatprep.subr.bf16.mxu1 %v1028_v25 }
  0x1c   :  { %928 = vmatpush3.bf16.msra.mxu0 %v1029_v26 }
  0x1d   :  { %950 = vmatpush3.bf16.msra.mxu1 %v1030_v27  ;;  %929 = vmatprep.subr.bf16.mxu0 %v1031_v28 }
  0x1e   :  { %951 = vmatprep.subr.bf16.mxu1 %v1032_v29 }
  0x20   :  { %930 = vmatpush3.bf16.msra.mxu0 %v1033_v30 }
  0x21   :  { %952 = vmatpush3.bf16.msra.mxu1 %v1034_v31  ;;  %959 = vmatprep.subr.bf16.mxu0 %v1035_v34 }
  0x22   :  { %981 = vmatprep.subr.bf16.mxu1 %v1036_v35 }
  0x23   :  { %185 = vmatmul.mubr.bf16.vlgmr.msra.gmra.mrb[0].mxu0 %v1181_v32 }
  0x24   :  { %369 = vmatmul.mubr.bf16.vlgmr.msra.gmra.mrb[0].mxu1 %v1181_v32  ;;  %960 = vmatpush3.bf16.msra.mxu0 %v1037_v36 }
  0x25   :  { %982 = vmatpush3.bf16.msra.mxu1 %v1038_v37  ;;  %961 = vmatprep.subr.bf16.mxu0 %v1039_v38 }
  0x26   :  { %545 = vmatprep.mubr.bf16.mxu0 %v53_v33  ;;  %983 = vmatprep.subr.bf16.mxu1 %v1040_v39 }
  0x27   :  { %722 = vmatprep.mubr.bf16.mxu1 %v53_v33 }
  0x28   :  { %962 = vmatpush3.bf16.msra.mxu0 %v1041_v40 }
  0x29   :  { %984 = vmatpush3.bf16.msra.mxu1 %v1042_v41  ;;  %963 = vmatprep.subr.bf16.mxu0 %v1043_v42 }
  0x2a   :  { %985 = vmatprep.subr.bf16.mxu1 %v1044_v43 }
  0x2c   :  { %964 = vmatpush3.bf16.msra.mxu0 %v1045_v44 }
  0x2d   :  { %986 = vmatpush3.bf16.msra.mxu1 %v1046_v45  ;;  %965 = vmatprep.subr.bf16.mxu0 %v1047_v46 }
  0x2e   :  { %987 = vmatprep.subr.bf16.mxu1 %v1048_v47 }
  0x30   :  { %966 = vmatpush3.bf16.msra.mxu0 %v1049_v48 }
  0x31   :  { %988 = vmatpush3.bf16.msra.mxu1 %v1050_v49  ;;  %967 = vmatprep.subr.bf16.mxu0 %v1051_v50 }
  0x32   :  { %989 = vmatprep.subr.bf16.mxu1 %v1052_v51 }
  0x34   :  { %968 = vmatpush3.bf16.msra.mxu0 %v1053_v52 }
  0x35   :  { %990 = vmatpush3.bf16.msra.mxu1 %v1054_v53  ;;  %969 = vmatprep.subr.bf16.mxu0 %v1055_v54 }
  0x36   :  { %991 = vmatprep.subr.bf16.mxu1 %v1056_v55 }
  0x38   :  { %970 = vmatpush3.bf16.msra.mxu0 %v1057_v56 }
  0x39   :  { %992 = vmatpush3.bf16.msra.mxu1 %v1058_v57  ;;  %971 = vmatprep.subr.bf16.mxu0 %v1059_v58 }
  0x3a   :  { %993 = vmatprep.subr.bf16.mxu1 %v1060_v59 }
  0x3c   :  { %972 = vmatpush3.bf16.msra.mxu0 %v1061_v60 }
  0x3d   :  { %994 = vmatpush3.bf16.msra.mxu1 %v1062_v61  ;;  %973 = vmatprep.subr.bf16.mxu0 %v1063_v62 }
  0x3e   :  { %995 = vmatprep.subr.bf16.mxu1 %v1064_v63 }
  0x40   :  { %974 = vmatpush3.bf16.msra.mxu0 %v1065_v0 }
  0x41   :  { %996 = vmatpush3.bf16.msra.mxu1 %v1066_v1 }
  0x43   :  { %546 = vmatmul.mubr.bf16.vlgmr.msra.gmra.mrb[4].mxu0 %v1181_v32 }
  0x44   :  { %723 = vmatmul.mubr.bf16.vlgmr.msra.gmra.mrb[4].mxu1 %v1181_v32 }
  0xf6   :  { %v931_v2 = vpop.f32.mrb[0].mxu0 }
  0xf7   :  { %v953_v3 = vpop.f32.mrb[0].mxu1  ;;  %v932_v4 = vpop.f32.mrb[1].mxu0 }
  0xf8   :  { %v954_v5 = vpop.f32.mrb[1].mxu1  ;;  %v933_v6 = vadd.f32 %v932_v4, %v931_v2  ;;  %v934_v8 = vpop.f32.mrb[2].mxu0 }
  0xf9   :  { %v955_v7 = vadd.f32 %v954_v5, %v953_v3  ;;  %v956_v9 = vpop.f32.mrb[2].mxu1  ;;  %v935_v10 = vpop.f32.mrb[3].mxu0 }
  0xfa   :  { %v957_v11 = vpop.f32.mrb[3].mxu1  ;;  %v192_v12 = vmul.f32 0.0625, %v933_v6  ;;  %v195_v13 = vmul.f32 0.015625, %v933_v6  ;;  %v199_v14 = vmul.f32 0.0069444445, %v933_v6  ;;  %v203_v15 = vmul.f32 0.00390625, %v933_v6 }
  0xfb   :  { %v376_v16 = vmul.f32 0.0625, %v955_v7  ;;  %v378_v17 = vmul.f32 0.015625, %v955_v7  ;;  %v380_v18 = vmul.f32 0.0069444445, %v955_v7  ;;  %v382_v19 = vmul.f32 0.00390625, %v955_v7 }
  0xfc   :  { %194 = vst.msk [vmem:[%s1351_s2] sm:$0x1] %vm193_vm0, %v192_v12 }
  0xfd   :  { %759 = vst.msk [vmem:[%s1351_s2 + $0x3] sm:$0x2] %vm197_vm1, %v195_v13  ;;  %810 = vst.msk [vmem:[%s1351_s2 + $0x4] sm:$0x2] %vm197_vm1, %v378_v17 }
  0xfe   :  { %760 = vst.msk [vmem:[%s1351_s2 + $0x6] sm:$0x4] %vm201_vm2, %v199_v14  ;;  %811 = vst.msk [vmem:[%s1351_s2 + $0x7] sm:$0x4] %vm201_vm2, %v380_v18 }
  0xff   :  { %761 = vst.msk [vmem:[%s1351_s2 + $0x9] sm:$0x8] %vm205_vm3, %v203_v15  ;;  %812 = vst.msk [vmem:[%s1351_s2 + $0xa] sm:$0x8] %vm205_vm3, %v382_v19 }
 0x100   :  { %377 = vst.msk [vmem:[%s1351_s2 + $0x1] sm:$0x1] %vm193_vm0, %v376_v16 }
 0x116   :  { %v975_v20 = vpop.f32.mrb[4].mxu0 }
 0x117   :  { %v997_v21 = vpop.f32.mrb[4].mxu1  ;;  %v976_v22 = vpop.f32.mrb[5].mxu0 }
 0x118   :  { %v998_v23 = vpop.f32.mrb[5].mxu1  ;;  %v977_v24 = vadd.f32 %v976_v22, %v975_v20  ;;  %v978_v26 = vpop.f32.mrb[6].mxu0 }
 0x119   :  { %v999_v25 = vadd.f32 %v998_v23, %v997_v21  ;;  %v1000_v27 = vpop.f32.mrb[6].mxu1  ;;  %v979_v28 = vpop.f32.mrb[7].mxu0 }
 0x11a   :  { %v1001_v29 = vpop.f32.mrb[7].mxu1  ;;  %v553_v30 = vmul.f32 0.0625, %v977_v24  ;;  %v555_v31 = vmul.f32 0.015625, %v977_v24  ;;  %v557_v32 = vmul.f32 0.0069444445, %v977_v24  ;;  %v559_v33 = vmul.f32 0.00390625, %v977_v24 }
 0x11b   :  { %v730_v34 = vmul.f32 0.0625, %v999_v25  ;;  %v732_v35 = vmul.f32 0.015625, %v999_v25  ;;  %v734_v36 = vmul.f32 0.0069444445, %v999_v25  ;;  %v736_v37 = vmul.f32 0.00390625, %v999_v25 }
 0x11c   :  { %554 = vst.msk [vmem:[%s1351_s2 + $0x2] sm:$0x1] %vm193_vm0, %v553_v30 }
 0x11d   :  { %861 = vst.msk [vmem:[%s1351_s2 + $0x5] sm:$0x2] %vm197_vm1, %v555_v31  ;;  %912 = vst.msk [vmem:[%s1351_s2 + $0x6] sm:$0x2] %vm197_vm1, %v732_v35 }
 0x11e   :  { %862 = vst.msk [vmem:[%s1351_s2 + $0x8] sm:$0x4] %vm201_vm2, %v557_v32  ;;  %913 = vst.msk [vmem:[%s1351_s2 + $0x9] sm:$0x4] %vm201_vm2, %v734_v36 }
 0x11f   :  { %863 = vst.msk [vmem:[%s1351_s2 + $0xb] sm:$0x8] %vm205_vm3, %v559_v33  ;;  %914 = vst.msk [vmem:[%s1351_s2 + $0xc] sm:$0x8] %vm205_vm3, %v736_v37 }
 0x120   :  { %731 = vst.msk [vmem:[%s1351_s2 + $0x3] sm:$0x1] %vm193_vm0, %v730_v34 }

</bundles_post_ra>
